<compile_context>
chip_gen: v6e
topology: v6e:2x2x1
jax: 0.10.0
libtpu: 0.0.40
codegen_flags: <defaults>
</compile_context>

<pallas_src>
import math

import jax
import jax.numpy as jnp
from jax.experimental import pallas as pl
from jax.experimental.pallas import tpu as pltpu


# ----------------------------- spec (synthetic) -----------------------------
class Spec:
    """Minimal stand-in for the hvqa spec object."""
    relations = ["close", "above", "below"]
    _obj_types = [f"obj{i}" for i in range(12)]           # 12 object types
    _props = {"colour": [f"c{i}" for i in range(8)],      # 8 colours
              "rotation": [f"r{i}" for i in range(8)]}    # 8 rotations

    def obj_types(self):
        return self._obj_types

    def prop_names(self):
        return list(self._props.keys())

    def prop_values(self, prop):
        return self._props[prop]


def obj_enc_size(spec):
    enc = 4 + len(spec.obj_types())
    for p in spec.prop_names():
        enc += len(spec.prop_values(p))
    return enc


FEAT1, FEAT2, FEAT3 = 1024, 256, 64
R_PAD = 128      # folded relation-head output padded to a full lane width
LANE = 128
SUBLANE = 8


def _round_up(v, m):
    return ((v + m - 1) // m) * m


# ------------------------------- Pallas kernel -------------------------------
def relcls_kernel(x_ref, w1_ref, b1_ref, w2_ref, b2_ref, wh_ref, bh_ref, out_ref):
    # encoder Linear -> (Dropout = identity in eval) -> Linear, then the folded
    # (layer3 @ all-heads) matmul.  bf16 MXU inputs, f32 accumulation; bias-add
    # and the sigmoid epilogue stay in f32.
    h = jnp.dot(x_ref[...].astype(jnp.bfloat16), w1_ref[...],
                preferred_element_type=jnp.float32) + b1_ref[...]
    h = jnp.dot(h.astype(jnp.bfloat16), w2_ref[...],
                preferred_element_type=jnp.float32) + b2_ref[...]
    logits = jnp.dot(h.astype(jnp.bfloat16), wh_ref[...],
                     preferred_element_type=jnp.float32) + bh_ref[...]
    out_ref[...] = jax.nn.sigmoid(logits)


def _choose_block_n(n, block_n):
    if n <= 512:
        # Small/medium batch: a single grid step.  Splitting a tiny tile across
        # two steps only adds ~0.35us of step overhead (and starves the MXU),
        # even on v7x's two TensorCores.
        return _round_up(n, SUBLANE)
    # Large batch: big MXU tiles, but keep >= 2 grid steps so the "parallel"
    # axis can be sharded across both v7x TensorCores; never drop below an
    # MXU-sized 256-row tile.
    bn = min(_round_up(block_n, SUBLANE), _round_up(pl.cdiv(n, 2), SUBLANE))
    return max(256, bn)


def relation_classifier_forward(x, params, relations, *, block_n=1024):
    """x: (N, enc_size*2) f32. Returns {rel: (N, 1) f32} (eval-mode forward)."""
    n, enc = x.shape
    w1, b1, w2, b2, wh, bh = params
    enc_pad = w1.shape[0]
    if enc < enc_pad:                       # lane-dense x tile (zero pad 64 -> 128)
        x = jnp.pad(x, ((0, 0), (0, enc_pad - enc)))

    bn = _choose_block_n(n, block_n)
    grid = (pl.cdiv(n, bn),)

    full = lambda shape: pl.BlockSpec(shape, lambda i: (0, 0))

    weight_elems = enc_pad * FEAT1 + FEAT1 * FEAT2 + FEAT2 * R_PAD
    cost = pl.CostEstimate(
        flops=2 * n * weight_elems,
        transcendentals=n * R_PAD,                       # sigmoid -> exp
        bytes_accessed=(n * enc_pad * 4 + n * R_PAD * 4  # x read + out write
                        + weight_elems * 2               # bf16 weights
                        + 4 * (FEAT1 + FEAT2 + R_PAD)))  # f32 biases

    out = pl.pallas_call(
        relcls_kernel,
        out_shape=jax.ShapeDtypeStruct((n, R_PAD), jnp.float32),
        grid_spec=pltpu.PrefetchScalarGridSpec(
            num_scalar_prefetch=0,
            grid=grid,
            in_specs=[
                pl.BlockSpec((bn, enc_pad), lambda i: (i, 0)),    # x tile
                # weights/biases: constant index_map -> DMAed once, reused
                full((enc_pad, FEAT1)), full((1, FEAT1)),
                full((FEAT1, FEAT2)), full((1, FEAT2)),
                full((FEAT2, R_PAD)), full((1, R_PAD)),
            ],
            out_specs=pl.BlockSpec((bn, R_PAD), lambda i: (i, 0)),
        ),
        compiler_params=pltpu.CompilerParams(
            dimension_semantics=("parallel",),
            vmem_limit_bytes=32 * 1024 * 1024),
        cost_estimate=cost,
    )(x, w1, b1, w2, b2, wh, bh)

    probs = out[:, :len(relations)]          # single slice of the 128-wide slab
    return {rel: probs[:, r:r + 1] for r, rel in enumerate(relations)}


# --------------------------- deterministic params ----------------------------
def init_linear(key, fan_in, fan_out):
    """PyTorch nn.Linear default init: U(-1/sqrt(fan_in), 1/sqrt(fan_in))."""
    kw, kb = jax.random.split(key)
    bound = 1.0 / math.sqrt(fan_in)
    w = jax.random.uniform(kw, (fan_in, fan_out), jnp.float32, -bound, bound)
    b = jax.random.uniform(kb, (1, fan_out), jnp.float32, -bound, bound)
    return w, b


def init_params(key, enc_size, relations):
    """Returns (kernel_params, f32_reference_params)."""
    k1, k2, k3, kr = jax.random.split(key, 4)
    w1, b1 = init_linear(k1, enc_size, FEAT1)
    w2, b2 = init_linear(k2, FEAT1, FEAT2)
    w3, b3 = init_linear(k3, FEAT2, FEAT3)
    heads = [init_linear(rk, FEAT3, 1) for rk in jax.random.split(kr, len(relations))]

    # (a) eval-mode fold of layer3 + all relation heads into one matrix.
    wr = jnp.concatenate([w for w, _ in heads], axis=1)          # (64, n_rel)
    br = jnp.concatenate([b for _, b in heads], axis=1)          # (1, n_rel)
    wh = w3 @ wr                                                 # (256, n_rel) f32
    bh = b3 @ wr + br                                            # (1, n_rel)
    wh = jnp.pad(wh, ((0, 0), (0, R_PAD - len(relations))))
    bh = jnp.pad(bh, ((0, 0), (0, R_PAD - len(relations))))
    # (b) lane-dense x path: zero-pad w1 rows enc -> multiple of 128.
    enc_pad = _round_up(enc_size, LANE)
    w1p = jnp.pad(w1, ((0, enc_pad - enc_size), (0, 0)))
    # (c) bf16 weights (MXU-native, half the weight DMA); biases stay f32.
    bf = jnp.bfloat16
    kernel_params = (w1p.astype(bf), b1, w2.astype(bf), b2, wh.astype(bf), bh)
    ref_params = (w1, b1, w2, b2, w3, b3, heads)
    return kernel_params, ref_params


# ------------------------------ reference checks ------------------------------
def reference_forward_f32(x, ref_params, relations):
    """Original module math (eval mode, pure f32, un-folded layers)."""
    w1, b1, w2, b2, w3, b3, heads = ref_params
    h = x @ w1 + b1
    h = h @ w2 + b2
    h = h @ w3 + b3
    return {rel: jax.nn.sigmoid(h @ w + b)
            for rel, (w, b) in zip(relations, heads)}


def reference_forward_quant(x, kernel_params, relations):
    """Pure-JAX mirror of the kernel's bf16-input / f32-acc math (tight check)."""
    w1, b1, w2, b2, wh, bh = kernel_params
    f32 = lambda a: a.astype(jnp.float32)
    q = lambda a: a.astype(jnp.bfloat16).astype(jnp.float32)     # bf16 quantise
    xp = jnp.pad(x, ((0, 0), (0, w1.shape[0] - x.shape[1])))
    h = q(xp) @ f32(w1) + b1
    h = q(h) @ f32(w2) + b2
    out = jax.nn.sigmoid(q(h) @ f32(wh) + bh)
    return {rel: out[:, r:r + 1] for r, rel in enumerate(relations)}


if __name__ == "__main__":
    spec = Spec()
    enc_size = obj_enc_size(spec) * 2        # (4 + 12 + 8 + 8) * 2 = 64
    batch = 16

    key = jax.random.PRNGKey(0)
    kx, kp = jax.random.split(key)
    x = jax.random.normal(kx, (batch, enc_size), jnp.float32)
    kernel_params, ref_params = init_params(kp, enc_size, spec.relations)

    outs = relation_classifier_forward(x, kernel_params, spec.relations)
    outs = jax.tree_util.tree_map(jax.block_until_ready, outs)

    tight = reference_forward_quant(x, kernel_params, spec.relations)   # kernel math
    loose = reference_forward_f32(x, ref_params, spec.relations)        # original model
    for rel in spec.relations:
        assert outs[rel].shape == (batch, 1)
        assert jnp.allclose(outs[rel], tight[rel], atol=1e-3, rtol=1e-3), rel
        assert jnp.allclose(outs[rel], loose[rel], atol=2e-2, rtol=0.0), rel

    print("KERNEL_OK")
</pallas_src>

<mosaic_0001>
module attributes {stable_mosaic.version = 11 : i64} {
  func.func @relcls_kernel(%arg0: i32, %arg1: memref<16x128xf32, #tpu.memory_space<vmem>>, %arg2: memref<128x1024xbf16, #tpu.memory_space<vmem>>, %arg3: memref<1x1024xf32, #tpu.memory_space<vmem>>, %arg4: memref<1024x256xbf16, #tpu.memory_space<vmem>>, %arg5: memref<1x256xf32, #tpu.memory_space<vmem>>, %arg6: memref<256x128xbf16, #tpu.memory_space<vmem>>, %arg7: memref<1x128xf32, #tpu.memory_space<vmem>>, %arg8: memref<16x128xf32, #tpu.memory_space<vmem>>) attributes {dimension_semantics = [#tpu.dimension_semantics<parallel>], iteration_bounds = array<i64: 1>, scalar_prefetch = 0 : i64, scratch_operands = 0 : i64, tpu.core_type = #tpu.core_type<tc>, window_params = [{transform_indices = @transform_0, window_bounds = array<i64: 16, 128>}, {pipeline_mode = #tpu.pipeline_mode<synchronous>, transform_indices = @transform_1, window_bounds = array<i64: 128, 1024>}, {pipeline_mode = #tpu.pipeline_mode<synchronous>, transform_indices = @transform_2, window_bounds = array<i64: 1, 1024>}, {pipeline_mode = #tpu.pipeline_mode<synchronous>, transform_indices = @transform_3, window_bounds = array<i64: 1024, 256>}, {pipeline_mode = #tpu.pipeline_mode<synchronous>, transform_indices = @transform_4, window_bounds = array<i64: 1, 256>}, {pipeline_mode = #tpu.pipeline_mode<synchronous>, transform_indices = @transform_5, window_bounds = array<i64: 256, 128>}, {pipeline_mode = #tpu.pipeline_mode<synchronous>, transform_indices = @transform_6, window_bounds = array<i64: 1, 128>}, {transform_indices = @transform_7, window_bounds = array<i64: 16, 128>}]} {
    %c0 = arith.constant 0 : index
    %c0_0 = arith.constant 0 : index
    %0 = vector.load %arg1[%c0, %c0_0] : memref<16x128xf32, #tpu.memory_space<vmem>>, vector<16x128xf32>
    %1 = arith.truncf %0 : vector<16x128xf32> to vector<16x128xbf16>
    %c0_1 = arith.constant 0 : index
    %c0_2 = arith.constant 0 : index
    %2 = vector.load %arg2[%c0_1, %c0_2] : memref<128x1024xbf16, #tpu.memory_space<vmem>>, vector<128x1024xbf16>
    %cst = arith.constant dense<0.000000e+00> : vector<16x1024xf32>
    %3 = tpu.matmul %1, %2, %cst {dimension_numbers = #tpu.dot_dimension_numbers<[1], [0], [0], [1], [0, 0, 1, 1], [], []>} : vector<16x128xbf16>, vector<128x1024xbf16>, vector<16x1024xf32> -> vector<16x1024xf32>
    %c0_3 = arith.constant 0 : index
    %c0_4 = arith.constant 0 : index
    %4 = vector.load %arg3[%c0_3, %c0_4] : memref<1x1024xf32, #tpu.memory_space<vmem>>, vector<1x1024xf32>
    %5 = vector.broadcast %4 : vector<1x1024xf32> to vector<16x1024xf32>
    %6 = arith.addf %3, %5 : vector<16x1024xf32>
    %7 = arith.truncf %6 : vector<16x1024xf32> to vector<16x1024xbf16>
    %c0_5 = arith.constant 0 : index
    %c0_6 = arith.constant 0 : index
    %8 = vector.load %arg4[%c0_5, %c0_6] : memref<1024x256xbf16, #tpu.memory_space<vmem>>, vector<1024x256xbf16>
    %cst_7 = arith.constant dense<0.000000e+00> : vector<16x256xf32>
    %9 = tpu.matmul %7, %8, %cst_7 {dimension_numbers = #tpu.dot_dimension_numbers<[1], [0], [0], [1], [0, 0, 1, 1], [], []>} : vector<16x1024xbf16>, vector<1024x256xbf16>, vector<16x256xf32> -> vector<16x256xf32>
    %c0_8 = arith.constant 0 : index
    %c0_9 = arith.constant 0 : index
    %10 = vector.load %arg5[%c0_8, %c0_9] : memref<1x256xf32, #tpu.memory_space<vmem>>, vector<1x256xf32>
    %11 = vector.broadcast %10 : vector<1x256xf32> to vector<16x256xf32>
    %12 = arith.addf %9, %11 : vector<16x256xf32>
    %13 = arith.truncf %12 : vector<16x256xf32> to vector<16x256xbf16>
    %c0_10 = arith.constant 0 : index
    %c0_11 = arith.constant 0 : index
    %14 = vector.load %arg6[%c0_10, %c0_11] : memref<256x128xbf16, #tpu.memory_space<vmem>>, vector<256x128xbf16>
    %cst_12 = arith.constant dense<0.000000e+00> : vector<16x128xf32>
    %15 = tpu.matmul %13, %14, %cst_12 {dimension_numbers = #tpu.dot_dimension_numbers<[1], [0], [0], [1], [0, 0, 1, 1], [], []>} : vector<16x256xbf16>, vector<256x128xbf16>, vector<16x128xf32> -> vector<16x128xf32>
    %c0_13 = arith.constant 0 : index
    %c0_14 = arith.constant 0 : index
    %16 = vector.load %arg7[%c0_13, %c0_14] : memref<1x128xf32, #tpu.memory_space<vmem>>, vector<1x128xf32>
    %17 = vector.broadcast %16 : vector<1x128xf32> to vector<16x128xf32>
    %18 = arith.addf %15, %17 : vector<16x128xf32>
    %19 = arith.negf %18 : vector<16x128xf32>
    %20 = math.exp %19 : vector<16x128xf32>
    %cst_15 = arith.constant 1.000000e+00 : f32
    %21 = vector.broadcast %cst_15 : f32 to vector<16x128xf32>
    %22 = arith.addf %21, %20 : vector<16x128xf32>
    %23 = arith.divf %21, %22 : vector<16x128xf32>
    %c0_16 = arith.constant 0 : index
    %c0_17 = arith.constant 0 : index
    %24 = vector.load %arg8[%c0_16, %c0_17] : memref<16x128xf32, #tpu.memory_space<vmem>>, vector<16x128xf32>
    tpu.vector_store %arg8[%c0_16, %c0_17], %23 {strides = array<i32>} : memref<16x128xf32, #tpu.memory_space<vmem>>, vector<16x128xf32>,
    return
  }
  func.func @transform_0(%arg0: i32) -> (i32, i32) {
    %c0_i32 = arith.constant 0 : i32
    %c0_i32_0 = arith.constant 0 : i32
    return %arg0, %c0_i32 : i32, i32
  }
  func.func @transform_1(%arg0: i32) -> (i32, i32) {
    %c0_i32 = arith.constant 0 : i32
    %c0_i32_0 = arith.constant 0 : i32
    %c0_i32_1 = arith.constant 0 : i32
    return %c0_i32, %c0_i32_0 : i32, i32
  }
  func.func @transform_2(%arg0: i32) -> (i32, i32) {
    %c0_i32 = arith.constant 0 : i32
    %c0_i32_0 = arith.constant 0 : i32
    %c0_i32_1 = arith.constant 0 : i32
    return %c0_i32, %c0_i32_0 : i32, i32
  }
  func.func @transform_3(%arg0: i32) -> (i32, i32) {
    %c0_i32 = arith.constant 0 : i32
    %c0_i32_0 = arith.constant 0 : i32
    %c0_i32_1 = arith.constant 0 : i32
    return %c0_i32, %c0_i32_0 : i32, i32
  }
  func.func @transform_4(%arg0: i32) -> (i32, i32) {
    %c0_i32 = arith.constant 0 : i32
    %c0_i32_0 = arith.constant 0 : i32
    %c0_i32_1 = arith.constant 0 : i32
    return %c0_i32, %c0_i32_0 : i32, i32
  }
  func.func @transform_5(%arg0: i32) -> (i32, i32) {
    %c0_i32 = arith.constant 0 : i32
    %c0_i32_0 = arith.constant 0 : i32
    %c0_i32_1 = arith.constant 0 : i32
    return %c0_i32, %c0_i32_0 : i32, i32
  }
  func.func @transform_6(%arg0: i32) -> (i32, i32) {
    %c0_i32 = arith.constant 0 : i32
    %c0_i32_0 = arith.constant 0 : i32
    %c0_i32_1 = arith.constant 0 : i32
    return %c0_i32, %c0_i32_0 : i32, i32
  }
  func.func @transform_7(%arg0: i32) -> (i32, i32) {
    %c0_i32 = arith.constant 0 : i32
    %c0_i32_0 = arith.constant 0 : i32
    return %arg0, %c0_i32 : i32, i32
  }
}

</mosaic_0001>

<bundles_post_ra>
// kernel: tpu_custom_call.1
= control target key start
LH: loop header
LB: loop body
LE: loop exit
PB: predicated region body
PF: predicated region fallthrough
CT: control target
= control target key end

     0   :  { %12 = vsyncpa [#allocation3], 0  ;;  %s2592_s0 = inlined_call_operand.hbm [shape: f32[16,128], index: 0, kind: input, shape index: {}]   ;;  %s2593_s1 = inlined_call_operand.hbm [shape: bf16[128,1024], index: 1, kind: input, shape index: {}]   ;;  %s2594_s2 = inlined_call_operand.hbm [shape: f32[1,1024], index: 2, kind: input, shape index: {}]   ;;  %s2595_s3 = inlined_call_operand.hbm [shape: bf16[1024,256], index: 3, kind: input, shape index: {}]   ;;  %s2596_s4 = inlined_call_operand.vmem [shape: f32[1,256], index: 4, kind: input, shape index: {}]   ;;  %s2597_s5 = inlined_call_operand.hbm [shape: bf16[256,128], index: 5, kind: input, shape index: {}]   ;;  %s2598_s6 = inlined_call_operand.vmem [shape: f32[1,128], index: 6, kind: input, shape index: {}]   ;;  %s2599_s7 = inlined_call_operand.hbm [shape: f32[16,128], index: 7, kind: output, shape index: {}]  }
   0x1   :  { %13 = vsyncpa [#allocation6], 0 }
   0x2   :  { %14 = vsyncpa [#allocation9], 0 }
   0x3   :  { %15 = vsyncpa [#allocation4], 0  ;;  %s2456_s24 = smov [#allocation5]  }
   0x4   :  { %s33_s25 = sshll.u32 %s2456_s24, 4  ;;  %s34_s25 = int_to_ptr.vmem [resolvable:$true] %s33_s25 }
   0x5   :  { %s2336_s26 = scalar_lea.vmem %s34_s25, 8192  ;;  %p2341_p1 = scmp.lt.s32.totalorder %s34_s25, %s34_s25 }
   0x6   :  { %p2337_p0 = scmp.ne.s32.totalorder %s34_s25, %s2336_s26  ;;  %p2342_p2 = scmp.lt.s32.totalorder %s2336_s26, %s2336_s26 }
   0x8   :  { %p2343_p3 = por %p2342_p2, %p2341_p1 }
   0xa   :  { %p2344_p4 = pnand %p2343_p3, %p2337_p0 }
   0xc   :  { %2347 = shalt.err (!%p2344_p4)
}
   0xd   :  { %s2457_s27 = smov 512   ;;  %s2458_s28 = smov 32  }
   0xe   :  { %39 = dma.hbm_to_vmem [thread:$0]  %s2593_s1, 8192, %s34_s25, [#allocation6], %s2457_s27, %s2457_s27, %s2458_s28  }
   0xf   :  { %s2459_s8 = smov [#allocation8]   ;;  %s2460_s10 = smov [#allocation2]  }
  0x10   :  { %s55_s9 = sshll.u32 %s2459_s8, 4  ;;  %s21_s11 = sshll.u32 %s2460_s10, 4  ;;  %s56_s9 = int_to_ptr.vmem [resolvable:$true] %s55_s9  ;;  %s22_s11 = int_to_ptr.vmem [resolvable:$true] %s21_s11 }
  0x11   :  { %s2356_s12 = scalar_lea.vmem %s56_s9, 16384  ;;  %p2361_p6 = scmp.lt.s32.totalorder %s56_s9, %s56_s9 }
  0x12   :  { %p2357_p5 = scmp.ne.s32.totalorder %s56_s9, %s2356_s12  ;;  %p2362_p7 = scmp.lt.s32.totalorder %s2356_s12, %s2356_s12 }
  0x14   :  { %p2363_p8 = por %p2362_p7, %p2361_p6 }
  0x16   :  { %p2364_p9 = pnand %p2363_p8, %p2357_p5 }
  0x18   :  { %2367 = shalt.err (!%p2364_p9)
}
  0x19   :  { %s2461_s13 = smov 128   ;;  %s2462_s14 = smov 8  }
  0x1a   :  { %61 = dma.hbm_to_vmem [thread:$0]  %s2595_s3, 16384, %s56_s9, [#allocation9], %s2461_s13, %s2461_s13, %s2462_s14  }
  0x1b   :  { %s2376_s1 = scalar_lea.vmem %s22_s11, 256  ;;  %p2381_p11 = scmp.lt.s32.totalorder %s22_s11, %s22_s11 }
  0x1c   :  { %p2377_p10 = scmp.ne.s32.totalorder %s22_s11, %s2376_s1  ;;  %p2382_p12 = scmp.lt.s32.totalorder %s2376_s1, %s2376_s1 }
  0x1e   :  { %p2383_p13 = por %p2382_p12, %p2381_p11 }
  0x20   :  { %p2384_p0 = pnand %p2383_p13, %p2377_p10 }
  0x22   :  { %2387 = shalt.err (!%p2384_p0)
}
  0x23   :  { %27 = dma.hbm_to_vmem [thread:$0]  %s2592_s0, 256, %s22_s11, [#allocation3], %s2461_s13, %s2461_s13, %s2462_s14  }
  0x24   :  { %s2463_s19 = smov [#allocation7]   ;;  %s2464_s21 = smov [#allocation10]  }
  0x25   :  { %s46_s20 = sshll.u32 %s2463_s19, 4  ;;  %s69_s3 = sshll.u32 %s2464_s21, 4  ;;  %s47_s20 = int_to_ptr.vmem [resolvable:$true] %s46_s20  ;;  %s70_s3 = int_to_ptr.vmem [resolvable:$true] %s69_s3 }
  0x26   :  { %s2396_s22 = scalar_lea.vmem %s47_s20, 128  ;;  %p2401_p2 = scmp.lt.s32.totalorder %s47_s20, %s47_s20 }
  0x27   :  { %p2397_p1 = scmp.ne.s32.totalorder %s47_s20, %s2396_s22  ;;  %p2402_p3 = scmp.lt.s32.totalorder %s2396_s22, %s2396_s22 }
  0x29   :  { %p2403_p4 = por %p2402_p3, %p2401_p2 }
  0x2b   :  { %p2404_p5 = pnand %p2403_p4, %p2397_p1 }
  0x2d   :  { %2407 = shalt.err (!%p2404_p5)
}
  0x2e   :  { %49 = dma.hbm_to_vmem [thread:$0]  %s2594_s2, 128, %s47_s20, [#allocation6]  }
  0x2f   :  { %s2416_s25 = scalar_lea.vmem %s70_s3, 2048  ;;  %p2421_p7 = scmp.lt.s32.totalorder %s70_s3, %s70_s3 }
  0x30   :  { %p2417_p6 = scmp.ne.s32.totalorder %s70_s3, %s2416_s25  ;;  %p2422_p8 = scmp.lt.s32.totalorder %s2416_s25, %s2416_s25 }
  0x32   :  { %p2423_p9 = por %p2422_p8, %p2421_p7 }
  0x34   :  { %p2424_p10 = pnand %p2423_p9, %p2417_p6 }
  0x36   :  { %2427 = shalt.err (!%p2424_p10)
}
  0x37   :  { %s2465_s0 = smov 64   ;;  %s2466_s26 = smov 4  }
  0x38   :  { %75 = dma.hbm_to_vmem [thread:$0]  %s2597_s5, 2048, %s70_s3, [#allocation9], %s2465_s0, %s2465_s0, %s2466_s26  }
  0x39   :  { %2448 = dma.done.wait [#allocation3], 256  }
  0x3a   :  { %2449 = vsyncadd [#allocation3], 4294967040 }
  0x3b   :  { %2450 = dma.done.wait [#allocation6], 8320  }
  0x3c   :  { %2451 = vsyncadd [#allocation6], 4294958976 }
  0x3d   :  { %2452 = dma.done.wait [#allocation9], 18432  }
  0x3e   :  { %2453 = vsyncadd [#allocation9], 4294948864  ;;  %v2467_v0 = vmov 0   ;;  %v153_v1 = vld [vmem:[#allocation5 + $0x1c0] sm:$0xff]  ;;  %v154_v3 = vld [vmem:[#allocation5 + $0x1c8] sm:$0xff]  ;;  %s2468_s30 = smov [#allocation11]  }
  0x3f   :  { %555 = vmatprep.mubr.bf16.mxu0 %v2467_v0  ;;  %598 = vmatprep.mubr.bf16.mxu1 %v2467_v0  ;;  %v157_v2 = vld [vmem:[#allocation5 + $0x1e0] sm:$0xff]  ;;  %v158_v5 = vld [vmem:[#allocation5 + $0x1e8] sm:$0xff]  ;;  %v155_v62 = vld [vmem:[#allocation5 + $0x1d0] sm:$0xff] }
  0x40   :  { %v1923_v4 = vcombine.high %v153_v1, %v157_v2  ;;  %v1922_v6 = vcombine.low %v153_v1, %v157_v2  ;;  %v145_v7 = vld [vmem:[#allocation5 + $0x180] sm:$0xff]  ;;  %v1925_v9 = vcombine.high %v154_v3, %v158_v5  ;;  %v1924_v10 = vcombine.low %v154_v3, %v158_v5  ;;  %v146_v12 = vld [vmem:[#allocation5 + $0x188] sm:$0xff]  ;;  %v159_v63 = vld [vmem:[#allocation5 + $0x1f0] sm:$0xff] }
  0x41   :  { %v149_v8 = vld [vmem:[#allocation5 + $0x1a0] sm:$0xff]  ;;  %v150_v13 = vld [vmem:[#allocation5 + $0x1a8] sm:$0xff]  ;;  %v156_v2 = vld [vmem:[#allocation5 + $0x1d8] sm:$0xff] }
  0x42   :  { %v1915_v11 = vcombine.high %v145_v7, %v149_v8  ;;  %v137_v14 = vld [vmem:[#allocation5 + $0x140] sm:$0xff]  ;;  %523 = vmatprep.subr.bf16.mxu0 %v1923_v4  ;;  %v1917_v15 = vcombine.high %v146_v12, %v150_v13  ;;  %v138_v17 = vld [vmem:[#allocation5 + $0x148] sm:$0xff]  ;;  %566 = vmatprep.subr.bf16.mxu1 %v1925_v9  ;;  %v1914_v19 = vcombine.low %v145_v7, %v149_v8  ;;  %v160_v3 = vld [vmem:[#allocation5 + $0x1f8] sm:$0xff] }
  0x43   :  { %v141_v16 = vld [vmem:[#allocation5 + $0x160] sm:$0xff]  ;;  %v142_v18 = vld [vmem:[#allocation5 + $0x168] sm:$0xff]  ;;  %524 = vmatpush1.bf16.msra.mxu0 %v1922_v6  ;;  %567 = vmatpush1.bf16.msra.mxu1 %v1924_v10  ;;  %v1916_v20 = vcombine.low %v146_v12, %v150_v13  ;;  %v94_v5 = vld [vmem:[#allocation2] sm:$0xff]  ;;  %v1927_v8 = vcombine.high %v155_v62, %v159_v63 }
  0x44   :  { %525 = vmatprep.subr.bf16.mxu0 %v1915_v11  ;;  %v1907_v21 = vcombine.high %v137_v14, %v141_v16  ;;  %568 = vmatprep.subr.bf16.mxu1 %v1917_v15  ;;  %v1909_v22 = vcombine.high %v138_v17, %v142_v18  ;;  %v129_v23 = vld [vmem:[#allocation5 + $0x100] sm:$0xff]  ;;  %v130_v25 = vld [vmem:[#allocation5 + $0x108] sm:$0xff]  ;;  %v1906_v27 = vcombine.low %v137_v14, %v141_v16  ;;  %v95_v6 = vld [vmem:[#allocation2 + $0x8] sm:$0xff] }
  0x45   :  { %v133_v24 = vld [vmem:[#allocation5 + $0x120] sm:$0xff]  ;;  %v134_v26 = vld [vmem:[#allocation5 + $0x128] sm:$0xff]  ;;  %v1908_v28 = vcombine.low %v138_v17, %v142_v18  ;;  %v147_v9 = vld [vmem:[#allocation5 + $0x190] sm:$0xff]  ;;  %v1929_v11 = vcombine.high %v156_v2, %v160_v3  ;;  %v2532_v13 = vpack.c.bf16 %v95_v6, %v94_v5  ;;  %v1926_v15 = vcombine.low %v155_v62, %v159_v63 }
  0x46   :  { %v1899_v29 = vcombine.high %v129_v23, %v133_v24  ;;  %v1901_v30 = vcombine.high %v130_v25, %v134_v26  ;;  %v121_v31 = vld [vmem:[#allocation5 + $0xc0] sm:$0xff]  ;;  %v122_v33 = vld [vmem:[#allocation5 + $0xc8] sm:$0xff]  ;;  %v1898_v35 = vcombine.low %v129_v23, %v133_v24  ;;  %v1900_v36 = vcombine.low %v130_v25, %v134_v26  ;;  %v151_v10 = vld [vmem:[#allocation5 + $0x1b0] sm:$0xff] }
  0x47   :  { %526 = vmatpush1.bf16.msra.mxu0 %v1914_v19  ;;  %569 = vmatpush1.bf16.msra.mxu1 %v1916_v20  ;;  %v125_v32 = vld [vmem:[#allocation5 + $0xe0] sm:$0xff]  ;;  %v126_v34 = vld [vmem:[#allocation5 + $0xe8] sm:$0xff]  ;;  %v148_v12 = vld [vmem:[#allocation5 + $0x198] sm:$0xff]  ;;  %v1928_v16 = vcombine.low %v156_v2, %v160_v3  ;;  %v1919_v17 = vcombine.high %v147_v9, %v151_v10  ;;  %v1918_v23 = vcombine.low %v147_v9, %v151_v10 }
  0x48   :  { %527 = vmatprep.subr.bf16.mxu0 %v1907_v21  ;;  %570 = vmatprep.subr.bf16.mxu1 %v1909_v22  ;;  %v1891_v37 = vcombine.high %v121_v31, %v125_v32  ;;  %v1893_v38 = vcombine.high %v122_v33, %v126_v34  ;;  %v113_v39 = vld [vmem:[#allocation5 + $0x80] sm:$0xff]  ;;  %v114_v41 = vld [vmem:[#allocation5 + $0x88] sm:$0xff]  ;;  %v1890_v43 = vcombine.low %v121_v31, %v125_v32  ;;  %v152_v14 = vld [vmem:[#allocation5 + $0x1b8] sm:$0xff] }
  0x49   :  { %v117_v40 = vld [vmem:[#allocation5 + $0xa0] sm:$0xff]  ;;  %v118_v42 = vld [vmem:[#allocation5 + $0xa8] sm:$0xff]  ;;  %v1892_v44 = vcombine.low %v122_v33, %v126_v34  ;;  %v139_v18 = vld [vmem:[#allocation5 + $0x150] sm:$0xff]  ;;  %v1921_v20 = vcombine.high %v148_v12, %v152_v14  ;;  %v1920_v24 = vcombine.low %v148_v12, %v152_v14 }
  0x4a   :  { %v1883_v45 = vcombine.high %v113_v39, %v117_v40  ;;  %v1885_v46 = vcombine.high %v114_v41, %v118_v42  ;;  %v105_v47 = vld [vmem:[#allocation5 + $0x40] sm:$0xff]  ;;  %v106_v49 = vld [vmem:[#allocation5 + $0x48] sm:$0xff]  ;;  %v1882_v51 = vcombine.low %v113_v39, %v117_v40  ;;  %v1884_v52 = vcombine.low %v114_v41, %v118_v42  ;;  %v143_v19 = vld [vmem:[#allocation5 + $0x170] sm:$0xff] }
  0x4b   :  { %528 = vmatpush1.bf16.msra.mxu0 %v1906_v27  ;;  %571 = vmatpush1.bf16.msra.mxu1 %v1908_v28  ;;  %v109_v48 = vld [vmem:[#allocation5 + $0x60] sm:$0xff]  ;;  %v110_v50 = vld [vmem:[#allocation5 + $0x68] sm:$0xff]  ;;  %v140_v21 = vld [vmem:[#allocation5 + $0x158] sm:$0xff]  ;;  %v1911_v25 = vcombine.high %v139_v18, %v143_v19  ;;  %v1910_v31 = vcombine.low %v139_v18, %v143_v19 }
  0x4c   :  { %529 = vmatprep.subr.bf16.mxu0 %v1899_v29  ;;  %572 = vmatprep.subr.bf16.mxu1 %v1901_v30  ;;  %v1875_v53 = vcombine.high %v105_v47, %v109_v48  ;;  %v97_v54 = vld [vmem:[#allocation5] sm:$0xff]  ;;  %v1877_v56 = vcombine.high %v106_v49, %v110_v50  ;;  %v98_v57 = vld [vmem:[#allocation5 + $0x8] sm:$0xff]  ;;  %v1874_v59 = vcombine.low %v105_v47, %v109_v48  ;;  %v144_v22 = vld [vmem:[#allocation5 + $0x178] sm:$0xff] }
  0x4d   :  { %v101_v55 = vld [vmem:[#allocation5 + $0x20] sm:$0xff]  ;;  %v102_v58 = vld [vmem:[#allocation5 + $0x28] sm:$0xff]  ;;  %v1876_v60 = vcombine.low %v106_v49, %v110_v50  ;;  %v131_v26 = vld [vmem:[#allocation5 + $0x110] sm:$0xff]  ;;  %v1913_v28 = vcombine.high %v140_v21, %v144_v22  ;;  %v1912_v32 = vcombine.low %v140_v21, %v144_v22 }
  0x4e   :  { %v1867_v61 = vcombine.high %v97_v54, %v101_v55  ;;  %v1869_v1 = vcombine.high %v98_v57, %v102_v58  ;;  %v1866_v4 = vcombine.low %v97_v54, %v101_v55  ;;  %v1868_v7 = vcombine.low %v98_v57, %v102_v58  ;;  %v135_v27 = vld [vmem:[#allocation5 + $0x130] sm:$0xff]  ;;  %v132_v29 = vld [vmem:[#allocation5 + $0x118] sm:$0xff] }
  0x4f   :  { %530 = vmatpush1.bf16.msra.mxu0 %v1898_v35  ;;  %573 = vmatpush1.bf16.msra.mxu1 %v1900_v36  ;;  %v136_v30 = vld [vmem:[#allocation5 + $0x138] sm:$0xff]  ;;  %v1903_v33 = vcombine.high %v131_v26, %v135_v27  ;;  %v123_v34 = vld [vmem:[#allocation5 + $0xd0] sm:$0xff]  ;;  %v1902_v39 = vcombine.low %v131_v26, %v135_v27 }
  0x50   :  { %531 = vmatprep.subr.bf16.mxu0 %v1891_v37  ;;  %574 = vmatprep.subr.bf16.mxu1 %v1893_v38  ;;  %v127_v35 = vld [vmem:[#allocation5 + $0xf0] sm:$0xff]  ;;  %v1905_v36 = vcombine.high %v132_v29, %v136_v30  ;;  %v124_v37 = vld [vmem:[#allocation5 + $0xd8] sm:$0xff]  ;;  %v1904_v40 = vcombine.low %v132_v29, %v136_v30 }
  0x51   :  { %v128_v38 = vld [vmem:[#allocation5 + $0xf8] sm:$0xff]  ;;  %v1895_v41 = vcombine.high %v123_v34, %v127_v35  ;;  %v115_v42 = vld [vmem:[#allocation5 + $0x90] sm:$0xff] }
  0x52   :  { %v1896_v47 = vcombine.low %v124_v37, %v128_v38  ;;  %v107_v49 = vld [vmem:[#allocation5 + $0x50] sm:$0xff]  ;;  %v2114_v3 = vld [vmem:[#allocation8 + $0x74] ss:$8 sps:$4 sm:$0xff]  }
  0x53   :  { %532 = vmatpush1.bf16.msra.mxu0 %v1890_v43  ;;  %575 = vmatpush1.bf16.msra.mxu1 %v1892_v44  ;;  %v1897_v43 = vcombine.high %v124_v37, %v128_v38  ;;  %v116_v44 = vld [vmem:[#allocation5 + $0x98] sm:$0xff]  ;;  %v111_v50 = vld [vmem:[#allocation5 + $0x70] sm:$0xff] }
  0x54   :  { %533 = vmatprep.subr.bf16.mxu0 %v1883_v45  ;;  %576 = vmatprep.subr.bf16.mxu1 %v1885_v46  ;;  %v120_v45 = vld [vmem:[#allocation5 + $0xb8] sm:$0xff]  ;;  %v1894_v46 = vcombine.low %v123_v34, %v127_v35  ;;  %v99_v57 = vld [vmem:[#allocation5 + $0x10] sm:$0xff]  ;;  %v1878_v62 = vcombine.low %v107_v49, %v111_v50 }
  0x55   :  { %v1888_v55 = vcombine.low %v116_v44, %v120_v45  ;;  %v103_v58 = vld [vmem:[#allocation5 + $0x30] sm:$0xff]  ;;  %v2117_v5 = vld [vmem:[#allocation8 + $0x174] ss:$8 sps:$4 sm:$0xff]  }
  0x56   :  { %v2120_v9 = vld [vmem:[#allocation8 + $0x64] ss:$8 sps:$4 sm:$0xff]   ;;  %v2121_v12 = vld [vmem:[#allocation8 + $0x160] ss:$8 sps:$4 sm:$0xff]   ;;  %v2126_v14 = vld [vmem:[#allocation8 + $0x54] ss:$8 sps:$4 sm:$0xff]  }
  0x57   :  { %534 = vmatpush1.bf16.msra.mxu0 %v1882_v51  ;;  %577 = vmatpush1.bf16.msra.mxu1 %v1884_v52  ;;  %v1889_v51 = vcombine.high %v116_v44, %v120_v45  ;;  %v108_v52 = vld [vmem:[#allocation5 + $0x58] sm:$0xff]  ;;  %v2123_v10 = vld [vmem:[#allocation8 + $0x164] ss:$8 sps:$4 sm:$0xff]   ;;  %v2133_v21 = vld [vmem:[#allocation8 + $0x140] ss:$8 sps:$4 sm:$0xff]  }
  0x58   :  { %535 = vmatprep.subr.bf16.mxu0 %v1875_v53  ;;  %578 = vmatprep.subr.bf16.mxu1 %v1877_v56  ;;  %v112_v53 = vld [vmem:[#allocation5 + $0x78] sm:$0xff]  ;;  %v1879_v56 = vcombine.high %v107_v49, %v111_v50  ;;  %v2132_v18 = vld [vmem:[#allocation8 + $0x44] ss:$8 sps:$4 sm:$0xff]   ;;  %v2142_v27 = vld [vmem:[#allocation8 + $0x20] ss:$8 sps:$4 sm:$0xff]  }
  0x59   :  { %v1880_v63 = vcombine.low %v108_v52, %v112_v53  ;;  %v2135_v19 = vld [vmem:[#allocation8 + $0x144] ss:$8 sps:$4 sm:$0xff]   ;;  %v2138_v22 = vld [vmem:[#allocation8 + $0x34] ss:$8 sps:$4 sm:$0xff]   ;;  %v2154_v35 = vld [vmem:[#allocation8] ss:$8 sps:$4 sm:$0xff]  }
  0x5a   :  { %v2147_v26 = vld [vmem:[#allocation8 + $0x124] ss:$8 sps:$4 sm:$0xff]   ;;  %v2150_v29 = vld [vmem:[#allocation8 + $0x14] ss:$8 sps:$4 sm:$0xff]   ;;  %v2178_v50 = vld [vmem:[#allocation8 + $0xc0] ss:$8 sps:$4 sm:$0xff]  }
  0x5b   :  { %536 = vmatpush1.bf16.msra.mxu0 %v1874_v59  ;;  %579 = vmatpush1.bf16.msra.mxu1 %v1876_v60  ;;  %v1881_v59 = vcombine.high %v108_v52, %v112_v53  ;;  %v100_v60 = vld [vmem:[#allocation5 + $0x18] sm:$0xff]  ;;  %v2159_v34 = vld [vmem:[#allocation8 + $0x104] ss:$8 sps:$4 sm:$0xff]  }
  0x5c   :  { %537 = vmatprep.subr.bf16.mxu0 %v1867_v61  ;;  %580 = vmatprep.subr.bf16.mxu1 %v1869_v1  ;;  %v104_v61 = vld [vmem:[#allocation5 + $0x38] sm:$0xff]  ;;  %v1871_v1 = vcombine.high %v99_v57, %v103_v58  ;;  %v2183_v49 = vld [vmem:[#allocation8 + $0x1c4] ss:$8 sps:$4 sm:$0xff]  }
  0x5d   :  { %v1873_v2 = vcombine.high %v100_v60, %v104_v61  ;;  %v1872_v6 = vcombine.low %v100_v60, %v104_v61  ;;  %v2153_v30 = vld [vmem:[#allocation8 + $0x114] ss:$8 sps:$4 sm:$0xff]  }
  0x5e   :  { %v2162_v37 = vld [vmem:[#allocation8 + $0xf4] ss:$8 sps:$4 sm:$0xff]  }
  0x5f   :  { %538 = vmatpush1.bf16.msra.mxu0 %v1866_v4  ;;  %581 = vmatpush1.bf16.msra.mxu1 %v1868_v7  ;;  %v1870_v4 = vcombine.low %v99_v57, %v103_v58  ;;  %v2112_v7 = vld [vmem:[#allocation8 + $0x70] ss:$8 sps:$4 sm:$0xff]   ;;  %v2165_v38 = vld [vmem:[#allocation8 + $0x1f4] ss:$8 sps:$4 sm:$0xff]   ;;  %v2195_v57 = vld [vmem:[#allocation8 + $0x1a4] ss:$8 sps:$4 sm:$0xff]  }
  0x60   :  { %609 = vmatprep.subr.bf16.mxu0 %v1927_v8  ;;  %652 = vmatprep.subr.bf16.mxu1 %v1929_v11  ;;  %v2115_v8 = vld [vmem:[#allocation8 + $0x170] ss:$8 sps:$4 sm:$0xff]   ;;  %v2118_v11 = vld [vmem:[#allocation8 + $0x60] ss:$8 sps:$4 sm:$0xff]   ;;  %v2174_v44 = vld [vmem:[#allocation8 + $0xd4] ss:$8 sps:$4 sm:$0xff]  }
  0x61   :  { %v2177_v45 = vld [vmem:[#allocation8 + $0x1d4] ss:$8 sps:$4 sm:$0xff]   ;;  %v2190_v58 = vld [vmem:[#allocation8 + $0xa0] ss:$8 sps:$4 sm:$0xff]  }
  0x62   :  { %556 = vmatmul.mubr.bf16.vlgmr.msra.gmra.mxu0 %v2532_v13  ;;  %599 = vmatmul.mubr.bf16.vlgmr.msra.gmra.mxu1 %v2532_v13  ;;  %v2186_v52 = vld [vmem:[#allocation8 + $0xb4] ss:$8 sps:$4 sm:$0xff]  }
  0x63   :  { %610 = vmatpush1.bf16.msra.mxu0 %v1926_v15  ;;  %653 = vmatpush1.bf16.msra.mxu1 %v1928_v16  ;;  %v2129_v15 = vld [vmem:[#allocation8 + $0x154] ss:$8 sps:$4 sm:$0xff]   ;;  %v2124_v16 = vld [vmem:[#allocation8 + $0x50] ss:$8 sps:$4 sm:$0xff]  }
  0x64   :  { %611 = vmatprep.subr.bf16.mxu0 %v1919_v17  ;;  %654 = vmatprep.subr.bf16.mxu1 %v1921_v20  ;;  %v2127_v17 = vld [vmem:[#allocation8 + $0x150] ss:$8 sps:$4 sm:$0xff]   ;;  %v2130_v20 = vld [vmem:[#allocation8 + $0x40] ss:$8 sps:$4 sm:$0xff]   ;;  %v2189_v53 = vld [vmem:[#allocation8 + $0x1b4] ss:$8 sps:$4 sm:$0xff]  }
  0x65   :  { %641 = vmatprep.mubr.bf16.mxu0 %v2467_v0  ;;  %684 = vmatprep.mubr.bf16.mxu1 %v2467_v0  ;;  %v119_v0 = vld [vmem:[#allocation5 + $0xb0] sm:$0xff]  ;;  %v2198_v60 = vld [vmem:[#allocation8 + $0x94] ss:$8 sps:$4 sm:$0xff]  }
  0x66   :  { %v1887_v48 = vcombine.high %v115_v42, %v119_v0  ;;  %v1886_v54 = vcombine.low %v115_v42, %v119_v0  ;;  %v2171_v42 = vld [vmem:[#allocation8 + $0x1e4] ss:$8 sps:$4 sm:$0xff]   ;;  %v2166_v0 = vld [vmem:[#allocation8 + $0xe0] ss:$8 sps:$4 sm:$0xff]   ;;  %v2201_v61 = vld [vmem:[#allocation8 + $0x194] ss:$8 sps:$4 sm:$0xff]  }
  0x67   :  { %612 = vmatpush1.bf16.msra.mxu0 %v1918_v23  ;;  %655 = vmatpush1.bf16.msra.mxu1 %v1920_v24  ;;  %v2141_v23 = vld [vmem:[#allocation8 + $0x134] ss:$8 sps:$4 sm:$0xff]   ;;  %v2139_v24 = vld [vmem:[#allocation8 + $0x130] ss:$8 sps:$4 sm:$0xff]  }
  0x68   :  { %613 = vmatprep.subr.bf16.mxu0 %v1911_v25  ;;  %656 = vmatprep.subr.bf16.mxu1 %v1913_v28  ;;  %v2144_v25 = vld [vmem:[#allocation8 + $0x24] ss:$8 sps:$4 sm:$0xff]   ;;  %v2145_v28 = vld [vmem:[#allocation8 + $0x120] ss:$8 sps:$4 sm:$0xff]  }
  0x6b   :  { %614 = vmatpush1.bf16.msra.mxu0 %v1910_v31  ;;  %657 = vmatpush1.bf16.msra.mxu1 %v1912_v32  ;;  %v2148_v31 = vld [vmem:[#allocation8 + $0x10] ss:$8 sps:$4 sm:$0xff]  }
  0x6c   :  { %615 = vmatprep.subr.bf16.mxu0 %v1903_v33  ;;  %658 = vmatprep.subr.bf16.mxu1 %v1905_v36  ;;  %v2151_v32 = vld [vmem:[#allocation8 + $0x110] ss:$8 sps:$4 sm:$0xff]   ;;  %v2156_v33 = vld [vmem:[#allocation8 + $0x4] ss:$8 sps:$4 sm:$0xff]   ;;  %v2157_v36 = vld [vmem:[#allocation8 + $0x100] ss:$8 sps:$4 sm:$0xff]  }
  0x6f   :  { %616 = vmatpush1.bf16.msra.mxu0 %v1902_v39  ;;  %659 = vmatpush1.bf16.msra.mxu1 %v1904_v40  ;;  %v2160_v39 = vld [vmem:[#allocation8 + $0xf0] ss:$8 sps:$4 sm:$0xff]  }
  0x70   :  { %617 = vmatprep.subr.bf16.mxu0 %v1895_v41  ;;  %660 = vmatprep.subr.bf16.mxu1 %v1897_v43  ;;  %v2163_v40 = vld [vmem:[#allocation8 + $0x1f0] ss:$8 sps:$4 sm:$0xff]   ;;  %v2168_v41 = vld [vmem:[#allocation8 + $0xe4] ss:$8 sps:$4 sm:$0xff]   ;;  %v2169_v43 = vld [vmem:[#allocation8 + $0x1e0] ss:$8 sps:$4 sm:$0xff]  }
  0x73   :  { %618 = vmatpush1.bf16.msra.mxu0 %v1894_v46  ;;  %661 = vmatpush1.bf16.msra.mxu1 %v1896_v47  ;;  %v2172_v46 = vld [vmem:[#allocation8 + $0xd0] ss:$8 sps:$4 sm:$0xff]  }
  0x74   :  { %619 = vmatprep.subr.bf16.mxu0 %v1887_v48  ;;  %662 = vmatprep.subr.bf16.mxu1 %v1889_v51  ;;  %v2175_v47 = vld [vmem:[#allocation8 + $0x1d0] ss:$8 sps:$4 sm:$0xff]   ;;  %v2180_v48 = vld [vmem:[#allocation8 + $0xc4] ss:$8 sps:$4 sm:$0xff]   ;;  %v2181_v51 = vld [vmem:[#allocation8 + $0x1c0] ss:$8 sps:$4 sm:$0xff]  }
  0x77   :  { %620 = vmatpush1.bf16.msra.mxu0 %v1886_v54  ;;  %663 = vmatpush1.bf16.msra.mxu1 %v1888_v55  ;;  %v2184_v54 = vld [vmem:[#allocation8 + $0xb0] ss:$8 sps:$4 sm:$0xff]  }
  0x78   :  { %621 = vmatprep.subr.bf16.mxu0 %v1879_v56  ;;  %664 = vmatprep.subr.bf16.mxu1 %v1881_v59  ;;  %v2187_v55 = vld [vmem:[#allocation8 + $0x1b0] ss:$8 sps:$4 sm:$0xff]   ;;  %v2192_v56 = vld [vmem:[#allocation8 + $0xa4] ss:$8 sps:$4 sm:$0xff]   ;;  %v2193_v59 = vld [vmem:[#allocation8 + $0x1a0] ss:$8 sps:$4 sm:$0xff]  }
  0x7b   :  { %622 = vmatpush1.bf16.msra.mxu0 %v1878_v62  ;;  %665 = vmatpush1.bf16.msra.mxu1 %v1880_v63  ;;  %v2196_v62 = vld [vmem:[#allocation8 + $0x90] ss:$8 sps:$4 sm:$0xff]  }
  0x7c   :  { %623 = vmatprep.subr.bf16.mxu0 %v1871_v1  ;;  %666 = vmatprep.subr.bf16.mxu1 %v1873_v2  ;;  %v2199_v63 = vld [vmem:[#allocation8 + $0x190] ss:$8 sps:$4 sm:$0xff]   ;;  %v2204_v1 = vld [vmem:[#allocation8 + $0x84] ss:$8 sps:$4 sm:$0xff]  }
  0x7d   :  { %v2207_v2 = vld [vmem:[#allocation8 + $0x184] ss:$8 sps:$4 sm:$0xff]  }
  0x7f   :  { %624 = vmatpush1.bf16.msra.mxu0 %v1870_v4  ;;  %667 = vmatpush1.bf16.msra.mxu1 %v1872_v6  ;;  %v2205_v4 = vld [vmem:[#allocation8 + $0x180] ss:$8 sps:$4 sm:$0xff]   ;;  %v2213_v6 = vld [vmem:[#allocation8 + $0x374] ss:$8 sps:$4 sm:$0xff]  }
  0x80   :  { %1483 = vmatprep.subr.bf16.mxu0 %v2114_v3  ;;  %1526 = vmatprep.subr.bf16.mxu1 %v2117_v5  ;;  %v2202_v3 = vld [vmem:[#allocation8 + $0x80] ss:$8 sps:$4 sm:$0xff]   ;;  %v2210_v5 = vld [vmem:[#allocation8 + $0x274] ss:$8 sps:$4 sm:$0xff]  }
  0x82   :  { %642 = vmatmul.mubr.bf16.vlgmr.msra.gmra.mxu0 %v2532_v13  ;;  %685 = vmatmul.mubr.bf16.vlgmr.msra.gmra.mxu1 %v2532_v13  ;;  %v2136_v13 = vld [vmem:[#allocation8 + $0x30] ss:$8 sps:$4 sm:$0xff]  }
  0x83   :  { %1484 = vmatpush1.bf16.msra.mxu0 %v2112_v7  ;;  %1527 = vmatpush1.bf16.msra.mxu1 %v2115_v8  ;;  %v163_v7 = vlaneseq }
  0x84   :  { %1485 = vmatprep.subr.bf16.mxu0 %v2120_v9  ;;  %1528 = vmatprep.subr.bf16.mxu1 %v2123_v10 }
  0x85   :  { %v2540_v8 = vshrl.u32 %v163_v7, 7 }
  0x87   :  { %1486 = vmatpush1.bf16.msra.mxu0 %v2118_v11  ;;  %1529 = vmatpush1.bf16.msra.mxu1 %v2121_v12  ;;  %v169_v9 = vsub.s32 1, %v2540_v8  ;;  %v165_v10 = vsub.s32 0, %v2540_v8  ;;  %v177_v12 = vsub.s32 3, %v2540_v8 }
  0x88   :  { %1487 = vmatprep.subr.bf16.mxu0 %v2126_v14  ;;  %1530 = vmatprep.subr.bf16.mxu1 %v2129_v15  ;;  %v2545_v14 = vld [vmem:[#allocation7] sm:$0xff]  ;;  %v173_v15 = vsub.s32 2, %v2540_v8 }
  0x8b   :  { %1488 = vmatpush1.bf16.msra.mxu0 %v2124_v16  ;;  %1531 = vmatpush1.bf16.msra.mxu1 %v2127_v17 }
  0x8c   :  { %1489 = vmatprep.subr.bf16.mxu0 %v2132_v18  ;;  %1532 = vmatprep.subr.bf16.mxu1 %v2135_v19  ;;  %v170_v18 = vrot.slane %v2545_v14, %v169_v9 }
  0x8f   :  { %1490 = vmatpush1.bf16.msra.mxu0 %v2130_v20  ;;  %1533 = vmatpush1.bf16.msra.mxu1 %v2133_v21  ;;  %v166_v20 = vrot.slane %v2545_v14, %v165_v10  ;;  %v178_v21 = vrot.slane %v2545_v14, %v177_v12 }
  0x90   :  { %1491 = vmatprep.subr.bf16.mxu0 %v2138_v22  ;;  %1534 = vmatprep.subr.bf16.mxu1 %v2141_v23  ;;  %v174_v23 = vrot.slane %v2545_v14, %v173_v15 }
  0x93   :  { %1492 = vmatpush1.bf16.msra.mxu0 %v2136_v13  ;;  %1535 = vmatpush1.bf16.msra.mxu1 %v2139_v24 }
  0x94   :  { %1493 = vmatprep.subr.bf16.mxu0 %v2144_v25  ;;  %1536 = vmatprep.subr.bf16.mxu1 %v2147_v26 }
  0x97   :  { %1494 = vmatpush1.bf16.msra.mxu0 %v2142_v27  ;;  %1537 = vmatpush1.bf16.msra.mxu1 %v2145_v28 }
  0x98   :  { %1495 = vmatprep.subr.bf16.mxu0 %v2150_v29  ;;  %1538 = vmatprep.subr.bf16.mxu1 %v2153_v30 }
  0x9b   :  { %1496 = vmatpush1.bf16.msra.mxu0 %v2148_v31  ;;  %1539 = vmatpush1.bf16.msra.mxu1 %v2151_v32 }
  0x9c   :  { %1497 = vmatprep.subr.bf16.mxu0 %v2156_v33  ;;  %1540 = vmatprep.subr.bf16.mxu1 %v2159_v34 }
  0x9f   :  { %1498 = vmatpush1.bf16.msra.mxu0 %v2154_v35  ;;  %1541 = vmatpush1.bf16.msra.mxu1 %v2157_v36  ;;  %v2208_v35 = vld [vmem:[#allocation8 + $0x270] ss:$8 sps:$4 sm:$0xff]  }
  0xa0   :  { %1499 = vmatprep.subr.bf16.mxu0 %v2162_v37  ;;  %1542 = vmatprep.subr.bf16.mxu1 %v2165_v38  ;;  %v2211_v38 = vld [vmem:[#allocation8 + $0x370] ss:$8 sps:$4 sm:$0xff]  }
  0xa3   :  { %1500 = vmatpush2.bf16.msra.mxu0 %v2160_v39  ;;  %1543 = vmatpush2.bf16.msra.mxu1 %v2163_v40  ;;  %v2216_v39 = vld [vmem:[#allocation8 + $0x264] ss:$8 sps:$4 sm:$0xff]  }
  0xa4   :  { %1501 = vmatprep.subr.bf16.mxu0 %v2168_v41  ;;  %1544 = vmatprep.subr.bf16.mxu1 %v2171_v42  ;;  %v2219_v41 = vld [vmem:[#allocation8 + $0x364] ss:$8 sps:$4 sm:$0xff]   ;;  %v2214_v42 = vld [vmem:[#allocation8 + $0x260] ss:$8 sps:$4 sm:$0xff]  }
  0xa7   :  { %1502 = vmatpush2.bf16.msra.mxu0 %v2166_v0  ;;  %1545 = vmatpush2.bf16.msra.mxu1 %v2169_v43  ;;  %v2217_v0 = vld [vmem:[#allocation8 + $0x360] ss:$8 sps:$4 sm:$0xff]   ;;  %v2222_v43 = vld [vmem:[#allocation8 + $0x254] ss:$8 sps:$4 sm:$0xff]  }
  0xa8   :  { %1503 = vmatprep.subr.bf16.mxu0 %v2174_v44  ;;  %1546 = vmatprep.subr.bf16.mxu1 %v2177_v45  ;;  %v2225_v44 = vld [vmem:[#allocation8 + $0x354] ss:$8 sps:$4 sm:$0xff]   ;;  %v2220_v45 = vld [vmem:[#allocation8 + $0x250] ss:$8 sps:$4 sm:$0xff]  }
  0xab   :  { %1504 = vmatpush2.bf16.msra.mxu0 %v2172_v46  ;;  %1547 = vmatpush2.bf16.msra.mxu1 %v2175_v47  ;;  %v2223_v46 = vld [vmem:[#allocation8 + $0x350] ss:$8 sps:$4 sm:$0xff]   ;;  %v2228_v47 = vld [vmem:[#allocation8 + $0x244] ss:$8 sps:$4 sm:$0xff]  }
  0xac   :  { %1505 = vmatprep.subr.bf16.mxu0 %v2180_v48  ;;  %1548 = vmatprep.subr.bf16.mxu1 %v2183_v49  ;;  %v2231_v48 = vld [vmem:[#allocation8 + $0x344] ss:$8 sps:$4 sm:$0xff]   ;;  %v2226_v49 = vld [vmem:[#allocation8 + $0x240] ss:$8 sps:$4 sm:$0xff]  }
  0xaf   :  { %1506 = vmatpush2.bf16.msra.mxu0 %v2178_v50  ;;  %1549 = vmatpush2.bf16.msra.mxu1 %v2181_v51  ;;  %v2229_v50 = vld [vmem:[#allocation8 + $0x340] ss:$8 sps:$4 sm:$0xff]   ;;  %v2234_v51 = vld [vmem:[#allocation8 + $0x234] ss:$8 sps:$4 sm:$0xff]  }
  0xb0   :  { %1507 = vmatprep.subr.bf16.mxu0 %v2186_v52  ;;  %1550 = vmatprep.subr.bf16.mxu1 %v2189_v53  ;;  %v2237_v52 = vld [vmem:[#allocation8 + $0x334] ss:$8 sps:$4 sm:$0xff]   ;;  %v2232_v53 = vld [vmem:[#allocation8 + $0x230] ss:$8 sps:$4 sm:$0xff]  }
  0xb3   :  { %1508 = vmatpush2.bf16.msra.mxu0 %v2184_v54  ;;  %1551 = vmatpush2.bf16.msra.mxu1 %v2187_v55  ;;  %v2235_v54 = vld [vmem:[#allocation8 + $0x330] ss:$8 sps:$4 sm:$0xff]   ;;  %v2240_v55 = vld [vmem:[#allocation8 + $0x224] ss:$8 sps:$4 sm:$0xff]  }
  0xb4   :  { %1509 = vmatprep.subr.bf16.mxu0 %v2192_v56  ;;  %1552 = vmatprep.subr.bf16.mxu1 %v2195_v57  ;;  %v2243_v56 = vld [vmem:[#allocation8 + $0x324] ss:$8 sps:$4 sm:$0xff]   ;;  %v2238_v57 = vld [vmem:[#allocation8 + $0x220] ss:$8 sps:$4 sm:$0xff]  }
  0xb7   :  { %1510 = vmatpush2.bf16.msra.mxu0 %v2190_v58  ;;  %1553 = vmatpush2.bf16.msra.mxu1 %v2193_v59  ;;  %v185_v58 = vsub.s32 5, %v2540_v8  ;;  %v2241_v59 = vld [vmem:[#allocation8 + $0x320] ss:$8 sps:$4 sm:$0xff]  }
  0xb8   :  { %1511 = vmatprep.subr.bf16.mxu0 %v2198_v60  ;;  %1554 = vmatprep.subr.bf16.mxu1 %v2201_v61  ;;  %v2246_v60 = vld [vmem:[#allocation8 + $0x214] ss:$8 sps:$4 sm:$0xff]   ;;  %v193_v61 = vsub.s32 7, %v2540_v8 }
  0xba   :  { %v194_v7 = vrot.slane %v2545_v14, %v193_v61 }
  0xbb   :  { %1512 = vmatpush2.bf16.msra.mxu0 %v2196_v62  ;;  %1555 = vmatpush2.bf16.msra.mxu1 %v2199_v63  ;;  %v2249_v62 = vld [vmem:[#allocation8 + $0x314] ss:$8 sps:$4 sm:$0xff]  }
  0xbc   :  { %1513 = vmatprep.subr.bf16.mxu0 %v2204_v1  ;;  %1556 = vmatprep.subr.bf16.mxu1 %v2207_v2  ;;  %v2244_v1 = vld [vmem:[#allocation8 + $0x210] ss:$8 sps:$4 sm:$0xff]   ;;  %v186_v2 = vrot.slane %v2545_v14, %v185_v58  ;;  %v2303_v58 = vld [vmem:[#allocation8 + $0x384] ss:$8 sps:$4 sm:$0xff]  }
  0xbf   :  { %1514 = vmatpush2.bf16.msra.mxu0 %v2202_v3  ;;  %1557 = vmatpush2.bf16.msra.mxu1 %v2205_v4  ;;  %v2247_v4 = vld [vmem:[#allocation8 + $0x310] ss:$8 sps:$4 sm:$0xff]  }
  0xc0   :  { %1569 = vmatprep.subr.bf16.mxu0 %v2210_v5  ;;  %1612 = vmatprep.subr.bf16.mxu1 %v2213_v6  ;;  %v2252_v5 = vld [vmem:[#allocation8 + $0x204] ss:$8 sps:$4 sm:$0xff]  }
 0x122   :  { %v557_v11 = vpop.f32.mrf.mxu0  ;;  %v600_v16 = vpop.f32.mrf.mxu1 }
 0x123   :  { %v558_v30 = vadd.f32 %v557_v11, %v166_v20  ;;  %v601_v33 = vadd.f32 %v600_v16, %v174_v23  ;;  %v2255_v11 = vld [vmem:[#allocation8 + $0x304] ss:$8 sps:$4 sm:$0xff]   ;;  %v2250_v16 = vld [vmem:[#allocation8 + $0x200] ss:$8 sps:$4 sm:$0xff]  }
 0x124   :  { %v559_v17 = vpop.f32.mrf.mxu0  ;;  %v602_v19 = vpop.f32.mrf.mxu1 }
 0x125   :  { %v560_v26 = vadd.f32 %v559_v17, %v170_v18  ;;  %v603_v31 = vadd.f32 %v602_v19, %v178_v21  ;;  %v2253_v19 = vld [vmem:[#allocation8 + $0x300] ss:$8 sps:$4 sm:$0xff]  }
 0x126   :  { %v561_v22 = vpop.f32.mrf.mxu0  ;;  %v604_v13 = vpop.f32.mrf.mxu1 }
 0x127   :  { %v562_v24 = vadd.f32 %v561_v22, %v166_v20  ;;  %v605_v27 = vadd.f32 %v604_v13, %v174_v23  ;;  %v2258_v20 = vld [vmem:[#allocation8 + $0x2f4] ss:$8 sps:$4 sm:$0xff]  }
 0x128   :  { %v563_v25 = vpop.f32.mrf.mxu0  ;;  %v606_v29 = vpop.f32.mrf.mxu1  ;;  %v2261_v23 = vld [vmem:[#allocation8 + $0x3f4] ss:$8 sps:$4 sm:$0xff]  }
 0x129   :  { %v564_v28 = vadd.f32 %v563_v25, %v170_v18  ;;  %v607_v32 = vadd.f32 %v606_v29, %v178_v21  ;;  %v695_v36 = vpack.c.bf16 %v562_v24, %v558_v30  ;;  %v697_v40 = vpack.c.bf16 %v605_v27, %v601_v33  ;;  %v2264_v29 = vld [vmem:[#allocation8 + $0x2e4] ss:$8 sps:$4 sm:$0xff]   ;;  %v2265_v33 = vld [vmem:[#allocation8 + $0x3e0] ss:$8 sps:$4 sm:$0xff]  }
 0x12b   :  { %v696_v34 = vpack.c.bf16 %v564_v28, %v560_v26  ;;  %v698_v37 = vpack.c.bf16 %v607_v32, %v603_v31  ;;  %v2256_v26 = vld [vmem:[#allocation8 + $0x2f0] ss:$8 sps:$4 sm:$0xff]   ;;  %v2267_v31 = vld [vmem:[#allocation8 + $0x3e4] ss:$8 sps:$4 sm:$0xff]   ;;  %v2262_v32 = vld [vmem:[#allocation8 + $0x2e0] ss:$8 sps:$4 sm:$0xff]  }
 0x12c   :  { %v2259_v28 = vld [vmem:[#allocation8 + $0x3f0] ss:$8 sps:$4 sm:$0xff]  }
 0x12d   :  { %1515 = vmatprep.mubr.bf16.mxu0 %v696_v34  ;;  %1558 = vmatprep.mubr.bf16.mxu1 %v698_v37  ;;  %v2270_v34 = vld [vmem:[#allocation8 + $0x2d4] ss:$8 sps:$4 sm:$0xff]   ;;  %v2271_v37 = vld [vmem:[#allocation8 + $0x3d0] ss:$8 sps:$4 sm:$0xff]  }
 0x12e   :  { %1516 = vmatmul.mubr.bf16.vlgmr.msra.gmra.mxu0 %v695_v36  ;;  %1559 = vmatmul.mubr.bf16.vlgmr.msra.gmra.mxu1 %v697_v40  ;;  %v2268_v36 = vld [vmem:[#allocation8 + $0x2d0] ss:$8 sps:$4 sm:$0xff]   ;;  %v2274_v40 = vld [vmem:[#allocation8 + $0x2c0] ss:$8 sps:$4 sm:$0xff]  }
 0x12f   :  { %1570 = vmatpush1.bf16.msra.mxu0 %v2208_v35  ;;  %1613 = vmatpush1.bf16.msra.mxu1 %v2211_v38  ;;  %v2273_v35 = vld [vmem:[#allocation8 + $0x3d4] ss:$8 sps:$4 sm:$0xff]   ;;  %v2276_v38 = vld [vmem:[#allocation8 + $0x2c4] ss:$8 sps:$4 sm:$0xff]  }
 0x130   :  { %1571 = vmatprep.subr.bf16.mxu0 %v2216_v39  ;;  %1614 = vmatprep.subr.bf16.mxu1 %v2219_v41  ;;  %v2279_v39 = vld [vmem:[#allocation8 + $0x3c4] ss:$8 sps:$4 sm:$0xff]   ;;  %v2277_v41 = vld [vmem:[#allocation8 + $0x3c0] ss:$8 sps:$4 sm:$0xff]  }
 0x133   :  { %1572 = vmatpush1.bf16.msra.mxu0 %v2214_v42  ;;  %1615 = vmatpush1.bf16.msra.mxu1 %v2217_v0  ;;  %v2282_v42 = vld [vmem:[#allocation8 + $0x2b4] ss:$8 sps:$4 sm:$0xff]  }
 0x134   :  { %1573 = vmatprep.subr.bf16.mxu0 %v2222_v43  ;;  %1616 = vmatprep.subr.bf16.mxu1 %v2225_v44  ;;  %v2285_v0 = vld [vmem:[#allocation8 + $0x3b4] ss:$8 sps:$4 sm:$0xff]   ;;  %v2280_v43 = vld [vmem:[#allocation8 + $0x2b0] ss:$8 sps:$4 sm:$0xff]  }
 0x135   :  { %v2283_v44 = vld [vmem:[#allocation8 + $0x3b0] ss:$8 sps:$4 sm:$0xff]  }
 0x137   :  { %1574 = vmatpush1.bf16.msra.mxu0 %v2220_v45  ;;  %1617 = vmatpush1.bf16.msra.mxu1 %v2223_v46  ;;  %v2288_v45 = vld [vmem:[#allocation8 + $0x2a4] ss:$8 sps:$4 sm:$0xff]  }
 0x138   :  { %1575 = vmatprep.subr.bf16.mxu0 %v2228_v47  ;;  %1618 = vmatprep.subr.bf16.mxu1 %v2231_v48  ;;  %v2291_v46 = vld [vmem:[#allocation8 + $0x3a4] ss:$8 sps:$4 sm:$0xff]   ;;  %v2286_v47 = vld [vmem:[#allocation8 + $0x2a0] ss:$8 sps:$4 sm:$0xff]   ;;  %v181_v48 = vsub.s32 4, %v2540_v8 }
 0x13b   :  { %1576 = vmatpush1.bf16.msra.mxu0 %v2226_v49  ;;  %1619 = vmatpush1.bf16.msra.mxu1 %v2229_v50  ;;  %v2289_v49 = vld [vmem:[#allocation8 + $0x3a0] ss:$8 sps:$4 sm:$0xff]   ;;  %v2294_v50 = vld [vmem:[#allocation8 + $0x294] ss:$8 sps:$4 sm:$0xff]  }
 0x13c   :  { %1577 = vmatprep.subr.bf16.mxu0 %v2234_v51  ;;  %1620 = vmatprep.subr.bf16.mxu1 %v2237_v52  ;;  %v189_v51 = vsub.s32 6, %v2540_v8  ;;  %v2297_v52 = vld [vmem:[#allocation8 + $0x394] ss:$8 sps:$4 sm:$0xff]  }
 0x13f   :  { %1578 = vmatpush1.bf16.msra.mxu0 %v2232_v53  ;;  %1621 = vmatpush1.bf16.msra.mxu1 %v2235_v54  ;;  %v2292_v53 = vld [vmem:[#allocation8 + $0x290] ss:$8 sps:$4 sm:$0xff]   ;;  %v182_v54 = vrot.slane %v2545_v14, %v181_v48 }
 0x140   :  { %1579 = vmatprep.subr.bf16.mxu0 %v2240_v55  ;;  %1622 = vmatprep.subr.bf16.mxu1 %v2243_v56  ;;  %v2295_v55 = vld [vmem:[#allocation8 + $0x390] ss:$8 sps:$4 sm:$0xff]   ;;  %v2300_v56 = vld [vmem:[#allocation8 + $0x284] ss:$8 sps:$4 sm:$0xff]  }
 0x142   :  { %v2558_v63 = vpop.f32.mrf.mxu0  ;;  %v2561_v3 = vpop.f32.mrf.mxu1 }
 0x143   :  { %1580 = vmatpush1.bf16.msra.mxu0 %v2238_v57  ;;  %1623 = vmatpush1.bf16.msra.mxu1 %v2241_v59  ;;  %v190_v57 = vrot.slane %v2545_v14, %v189_v51  ;;  %v2298_v59 = vld [vmem:[#allocation8 + $0x280] ss:$8 sps:$4 sm:$0xff]  }
 0x144   :  { %1581 = vmatprep.subr.bf16.mxu0 %v2246_v60  ;;  %v645_v6 = vpop.f32.mrf.mxu0  ;;  %1624 = vmatprep.subr.bf16.mxu1 %v2249_v62  ;;  %v688_v12 = vpop.f32.mrf.mxu1  ;;  %v644_v60 = vadd.f32 %v2558_v63, %v182_v54  ;;  %v2301_v62 = vld [vmem:[#allocation8 + $0x380] ss:$8 sps:$4 sm:$0xff]   ;;  %v2307_v63 = vld [vmem:[#allocation10 + $0x30] sm:$0xff]  }
 0x145   :  { %v646_v17 = vadd.f32 %v645_v6, %v186_v2  ;;  %v689_v21 = vadd.f32 %v688_v12, %v194_v7  ;;  %v2305_v6 = vld [vmem:[#allocation10 + $0x38] sm:$0xff]   ;;  %v2309_v12 = vld [vmem:[#allocation10 + $0x28] sm:$0xff]  }
 0x146   :  { %v2564_v15 = vpop.f32.mrf.mxu0  ;;  %v2566_v18 = vpop.f32.mrf.mxu1 }
 0x147   :  { %1582 = vmatpush1.bf16.msra.mxu0 %v2244_v1  ;;  %1625 = vmatpush1.bf16.msra.mxu1 %v2247_v4  ;;  %v648_v61 = vadd.f32 %v2564_v15, %v182_v54  ;;  %v687_v1 = vadd.f32 %v2561_v3, %v190_v57  ;;  %v2310_v3 = vld [vmem:[#allocation10 + $0x60] sm:$0xff]  }
 0x148   :  { %1583 = vmatprep.subr.bf16.mxu0 %v2252_v5  ;;  %v649_v22 = vpop.f32.mrf.mxu0  ;;  %1626 = vmatprep.subr.bf16.mxu1 %v2255_v11  ;;  %v692_v24 = vpop.f32.mrf.mxu1  ;;  %v2304_v5 = vld [vmem:[#allocation10 + $0x78] sm:$0xff]   ;;  %v2308_v11 = vld [vmem:[#allocation10 + $0x68] sm:$0xff]   ;;  %v2311_v15 = vld [vmem:[#allocation10 + $0x20] sm:$0xff]  }
 0x149   :  { %v650_v13 = vadd.f32 %v649_v22, %v186_v2  ;;  %v693_v25 = vadd.f32 %v692_v24, %v194_v7  ;;  %v691_v2 = vadd.f32 %v2566_v18, %v190_v57  ;;  %v699_v4 = vpack.c.bf16 %v648_v61, %v644_v60  ;;  %v2306_v7 = vld [vmem:[#allocation10 + $0x70] sm:$0xff]   ;;  %v2318_v22 = vld [vmem:[#allocation10 + $0x40] sm:$0xff]   ;;  %v2058_v57 = vld [vmem:[%s2598_s6] ss:$0 sm:$0xff]  ;;  %s1852_s6 = sshll.u32 %s2468_s30, 4  ;;  %s1853_s6 = int_to_ptr.vmem [resolvable:$true] %s1852_s6 }
 0x14a   :  { %v2314_v18 = vld [vmem:[#allocation10 + $0x50] sm:$0xff]   ;;  %s2428_s8 = scalar_lea.vmem %s1853_s6, 256  ;;  %p2433_p12 = scmp.lt.s32.totalorder %s1853_s6, %s1853_s6 }
 0x14b   :  { %1584 = vmatpush1.bf16.msra.mxu0 %v2250_v16  ;;  %v700_v27 = vpack.c.bf16 %v650_v13, %v646_v17  ;;  %1627 = vmatpush1.bf16.msra.mxu1 %v2253_v19  ;;  %v702_v30 = vpack.c.bf16 %v693_v25, %v689_v21  ;;  %v701_v14 = vpack.c.bf16 %v691_v2, %v687_v1  ;;  %v2312_v16 = vld [vmem:[#allocation10 + $0x58] sm:$0xff]   ;;  %v2315_v19 = vld [vmem:[#allocation10 + $0x10] sm:$0xff]   ;;  %v2317_v21 = vld [vmem:[#allocation10 + $0x8] sm:$0xff]   ;;  %p2429_p11 = scmp.ne.s32.totalorder %s1853_s6, %s2428_s8  ;;  %p2434_p13 = scmp.lt.s32.totalorder %s2428_s8, %s2428_s8 }
 0x14c   :  { %1585 = vmatprep.subr.bf16.mxu0 %v2258_v20  ;;  %1628 = vmatprep.subr.bf16.mxu1 %v2261_v23  ;;  %v2313_v17 = vld [vmem:[#allocation10 + $0x18] sm:$0xff]   ;;  %v2316_v20 = vld [vmem:[#allocation10 + $0x48] sm:$0xff]   ;;  %v2319_v23 = vld [vmem:[#allocation10] sm:$0xff]  }
 0x14d   :  { %1601 = vmatprep.mubr.bf16.mxu0 %v700_v27  ;;  %1644 = vmatprep.mubr.bf16.mxu1 %v702_v30  ;;  %v831_v27 = vld [vmem:[%s2596_s4] sm:$0x3]  ;;  %p2435_p0 = por %p2434_p13, %p2433_p12 }
 0x14f   :  { %1586 = vmatpush2.bf16.msra.mxu0 %v2256_v26  ;;  %1629 = vmatpush2.bf16.msra.mxu1 %v2259_v28  ;;  %p2436_p1 = pnand %p2435_p0, %p2429_p11 }
 0x150   :  { %1587 = vmatprep.subr.bf16.mxu0 %v2264_v29  ;;  %1630 = vmatprep.subr.bf16.mxu1 %v2267_v31  ;;  %v840_v29 = vrot.slane %v831_v27, %v169_v9  ;;  %v836_v31 = vrot.slane %v831_v27, %v165_v10 }
 0x153   :  { %1588 = vmatpush2.bf16.msra.mxu0 %v2262_v32  ;;  %1631 = vmatpush2.bf16.msra.mxu1 %v2265_v33 }
 0x154   :  { %1589 = vmatprep.subr.bf16.mxu0 %v2270_v34  ;;  %1632 = vmatprep.subr.bf16.mxu1 %v2273_v35 }
 0x157   :  { %1590 = vmatpush2.bf16.msra.mxu0 %v2268_v36  ;;  %1633 = vmatpush2.bf16.msra.mxu1 %v2271_v37 }
 0x158   :  { %1591 = vmatprep.subr.bf16.mxu0 %v2276_v38  ;;  %1634 = vmatprep.subr.bf16.mxu1 %v2279_v39 }
 0x15b   :  { %1592 = vmatpush2.bf16.msra.mxu0 %v2274_v40  ;;  %1635 = vmatpush2.bf16.msra.mxu1 %v2277_v41 }
 0x15c   :  { %1593 = vmatprep.subr.bf16.mxu0 %v2282_v42  ;;  %1636 = vmatprep.subr.bf16.mxu1 %v2285_v0 }
 0x15f   :  { %1594 = vmatpush2.bf16.msra.mxu0 %v2280_v43  ;;  %1637 = vmatpush2.bf16.msra.mxu1 %v2283_v44 }
 0x160   :  { %1595 = vmatprep.subr.bf16.mxu0 %v2288_v45  ;;  %1638 = vmatprep.subr.bf16.mxu1 %v2291_v46 }
 0x163   :  { %1596 = vmatpush2.bf16.msra.mxu0 %v2286_v47  ;;  %1639 = vmatpush2.bf16.msra.mxu1 %v2289_v49 }
 0x164   :  { %1597 = vmatprep.subr.bf16.mxu0 %v2294_v50  ;;  %1640 = vmatprep.subr.bf16.mxu1 %v2297_v52 }
 0x167   :  { %1598 = vmatpush2.bf16.msra.mxu0 %v2292_v53  ;;  %1641 = vmatpush2.bf16.msra.mxu1 %v2295_v55 }
 0x168   :  { %1599 = vmatprep.subr.bf16.mxu0 %v2300_v56  ;;  %1642 = vmatprep.subr.bf16.mxu1 %v2303_v58 }
 0x16b   :  { %1600 = vmatpush2.bf16.msra.mxu0 %v2298_v59  ;;  %1643 = vmatpush2.bf16.msra.mxu1 %v2301_v62 }
 0x16c   :  { %2077 = vmatprep.subr.bf16.mxu0 %v2304_v5 }
 0x16e   :  { %1602 = vmatmul.mubr.bf16.vlgmr.msra.gmra.mxu0 %v699_v4  ;;  %1645 = vmatmul.mubr.bf16.vlgmr.msra.gmra.mxu1 %v701_v14 }
 0x16f   :  { %2078 = vmatpush3.bf16.msra.mxu0 %v2305_v6 }
 0x170   :  { %2079 = vmatprep.subr.bf16.mxu0 %v2306_v7 }
 0x173   :  { %2080 = vmatpush3.bf16.msra.mxu0 %v2307_v63 }
 0x174   :  { %2081 = vmatprep.subr.bf16.mxu0 %v2308_v11 }
 0x177   :  { %2082 = vmatpush3.bf16.msra.mxu0 %v2309_v12 }
 0x178   :  { %2083 = vmatprep.subr.bf16.mxu0 %v2310_v3 }
 0x17b   :  { %2084 = vmatpush3.bf16.msra.mxu0 %v2311_v15 }
 0x17c   :  { %2085 = vmatprep.subr.bf16.mxu0 %v2312_v16 }
 0x17f   :  { %2086 = vmatpush3.bf16.msra.mxu0 %v2313_v17 }
 0x180   :  { %2087 = vmatprep.subr.bf16.mxu0 %v2314_v18 }
 0x183   :  { %2088 = vmatpush3.bf16.msra.mxu0 %v2315_v19 }
 0x184   :  { %2089 = vmatprep.subr.bf16.mxu0 %v2316_v20 }
 0x187   :  { %2090 = vmatpush3.bf16.msra.mxu0 %v2317_v21 }
 0x188   :  { %2091 = vmatprep.subr.bf16.mxu0 %v2318_v22 }
 0x18b   :  { %2092 = vmatpush3.bf16.msra.mxu0 %v2319_v23 }
 0x1ee   :  { %v1517_v13 = vpop.f32.mrf.mxu0  ;;  %v1560_v24 = vpop.f32.mrf.mxu1 }
 0x1ef   :  { %v1518_v36 = vadd.f32 %v1517_v13, %v836_v31 }
 0x1f0   :  { %v1519_v25 = vpop.f32.mrf.mxu0  ;;  %v1562_v26 = vpop.f32.mrf.mxu1 }
 0x1f1   :  { %v1520_v33 = vadd.f32 %v1519_v25, %v840_v29  ;;  %v1561_v43 = vadd.f32 %v1560_v24, %v1518_v36 }
 0x1f2   :  { %v1521_v28 = vpop.f32.mrf.mxu0  ;;  %v1564_v30 = vpop.f32.mrf.mxu1 }
 0x1f3   :  { %v1522_v34 = vadd.f32 %v1521_v28, %v836_v31  ;;  %v1563_v41 = vadd.f32 %v1562_v26, %v1520_v33 }
 0x1f4   :  { %v1523_v32 = vpop.f32.mrf.mxu0  ;;  %v1566_v35 = vpop.f32.mrf.mxu1 }
 0x1f5   :  { %v1524_v38 = vadd.f32 %v1523_v32, %v840_v29  ;;  %v1565_v42 = vadd.f32 %v1564_v30, %v1522_v34 }
 0x1f7   :  { %v1567_v45 = vadd.f32 %v1566_v35, %v1524_v38 }
 0x22e   :  { %v1603_v37 = vpop.f32.mrf.mxu0  ;;  %v1646_v39 = vpop.f32.mrf.mxu1 }
 0x22f   :  { %v1604_v8 = vadd.f32 %v1603_v37, %v1561_v43 }
 0x230   :  { %v1605_v40 = vpop.f32.mrf.mxu0  ;;  %v1648_v0 = vpop.f32.mrf.mxu1 }
 0x231   :  { %v1606_v9 = vadd.f32 %v1605_v40, %v1563_v41  ;;  %v1647_v53 = vadd.f32 %v1646_v39, %v1604_v8 }
 0x232   :  { %v1607_v44 = vpop.f32.mrf.mxu0  ;;  %v1650_v47 = vpop.f32.mrf.mxu1 }
 0x233   :  { %v1608_v46 = vadd.f32 %v1607_v44, %v1565_v42  ;;  %v1649_v51 = vadd.f32 %v1648_v0, %v1606_v9 }
 0x234   :  { %v1609_v10 = vpop.f32.mrf.mxu0  ;;  %v1652_v50 = vpop.f32.mrf.mxu1 }
 0x235   :  { %v1610_v48 = vadd.f32 %v1609_v10, %v1567_v45  ;;  %v1651_v49 = vadd.f32 %v1650_v47, %v1608_v46 }
 0x237   :  { %v1653_v52 = vadd.f32 %v1652_v50, %v1610_v48  ;;  %v1655_v55 = vpack.c.bf16 %v1651_v49, %v1647_v53 }
 0x239   :  { %v1656_v54 = vpack.c.bf16 %v1653_v52, %v1649_v51 }
 0x23b   :  { %1824 = vmatprep.mubr.bf16.mxu0 %v1656_v54 }
 0x23c   :  { %1825 = vmatmul.mubr.bf16.vlgmr.msra.gmra.mxu0 %v1655_v55 }
 0x2fc   :  { %v2093_v56 = vpop.f32.mrf.mxu0 }
 0x2fe   :  { %v2094_v58 = vpop.f32.mrf.mxu0 }
 0x2ff   :  { %v2095_v59 = vadd.f32 %v2094_v58, %v2093_v56 }
 0x300   :  { %v2096_v60 = vpop.f32.mrf.mxu0 }
 0x301   :  { %v1827_v61 = vadd.f32 %v2095_v59, %v2058_v57 }
 0x302   :  { %v2097_v62 = vpop.f32.mrf.mxu0 }
 0x303   :  { %v2075_v1 = vmul.f32 -1.442695, %v1827_v61  ;;  %v2098_v2 = vadd.f32 %v2097_v62, %v2096_v60 }
 0x305   :  { %2320 = vpow2.f32 %v2075_v1  ;;  %v1830_v4 = vadd.f32 %v2098_v2, %v2058_v57 }
 0x307   :  { %v2076_v14 = vmul.f32 -1.442695, %v1830_v4 }
 0x309   :  { %2322 = vpow2.f32 %v2076_v14 }
 0x312   :  { %v2321_v5 = vpop.eup %2320 }
 0x313   :  { %v1839_v6 = vadd.f32 1.0, %v2321_v5 }
 0x315   :  { %2324 = vrcp.f32 %v1839_v6 }
 0x316   :  { %v2323_v7 = vpop.eup %2322 }
 0x317   :  { %v1840_v63 = vadd.f32 1.0, %v2323_v7 }
 0x319   :  { %2326 = vrcp.f32 %v1840_v63 }
 0x322   :  { %v2325_v11 = vpop.eup %2324 }
 0x323   :  { %1845 = vst [vmem:[#allocation11] sm:$0xff] %v2325_v11 }
 0x326   :  { %v2327_v12 = vpop.eup %2326 }
 0x327   :  { %1846 = vst [vmem:[#allocation11 + $0x8] sm:$0xff] %v2327_v12 }
 0x328   :  { %2439 = shalt.err (!%p2436_p1)
}
 0x329   :  { %1858 = dma.vmem_to_hbm [thread:$0]  %s1853_s6, 256, %s2599_s7, [#allocation4], %s2461_s13, %s2461_s13, %s2462_s14  }
 0x32a   :  { %2454 = dma.done.wait [#allocation4], 256  }
 0x32b   :  { %2455 = vsyncadd [#allocation4], 4294967040 }
 0x32c   :  { %1862 = vsyncpa [#allocation3], 1 }
 0x32d   :  { %1863 = vsyncpa [#allocation6], 1 }
 0x32e   :  { %1864 = vsyncpa [#allocation9], 1 }
 0x32f   :  { %1865 = vsyncpa [#allocation4], 1 }

</bundles_post_ra>
